<compile_context>
chip_gen: v7x
topology: tpu7x:2x2x1
jax: 0.10.0
libtpu: 0.0.40
codegen_flags: <defaults>
</compile_context>

<pallas_src>
import functools

import numpy as np
import jax
import jax.numpy as jnp
from jax import lax
from jax.experimental import pallas as pl
from jax.experimental.pallas import tpu as pltpu


def _round_up(x, m):
    return ((x + m - 1) // m) * m


def _vmem_capacity_bytes():
    try:
        info = pltpu.get_tpu_info()
        cap = getattr(info, "vmem_capacity_bytes", None)
        if cap:
            return int(cap)
    except Exception:
        pass
    return 64 * 1024 * 1024  # conservative fallback (v7x per-TC VMEM)


# -----------------------------------------------------------------------------
# Pallas kernel: fused 4-branch 3x3 conv == 9 block-diagonal tap matmuls
# -----------------------------------------------------------------------------
def _make_kernel(Ho, Wo, KC, NO):
    M = Ho * Wo

    def kernel(p_ref, w_ref, b_ref, o_ref):
        # p_ref : (1, Ho+2, Wo+2, KC) bf16 -- 4 branch planes stacked on channels
        # w_ref : (9, KC, NO)         bf16 -- block-diagonal per-tap weights
        # b_ref : (1, NO)             f32
        # o_ref : (1, NO, M)          f32  -- NCHW-ordered (channels, pixels)
        plane = p_ref[0]                                        # (Hp, Wp, KC)
        acc = jnp.zeros((M, NO), jnp.float32)
        for kh in range(3):
            for kw in range(3):
                tap = plane[kh:kh + Ho, kw:kw + Wo, :]          # (Ho, Wo, KC)
                tap = tap.reshape(M, KC)                        # major-dim merge
                acc = acc + jnp.dot(tap, w_ref[kh * 3 + kw],
                                    preferred_element_type=jnp.float32)
        acc = acc + b_ref[...]                                  # (1, NO) broadcast
        o_ref[0] = acc.T.astype(o_ref.dtype)                    # on-chip transpose

    return kernel


def _fused_conv(planes, w_taps, bias, Ho, Wo):
    B, Hp, Wp, KC = planes.shape
    _, _, NO = w_taps.shape
    M = Ho * Wo

    # VMEM budget: lane-padded double-buffered blocks + in-kernel temporaries.
    in_blk = Hp * _round_up(Wp, 8) * _round_up(KC, 128) * 2           # bf16
    out_blk = _round_up(NO, 8) * _round_up(M, 128) * 4                # f32
    w_blk = 9 * _round_up(KC, 8) * _round_up(NO, 128) * 2
    tmp = _round_up(M, 8) * (2 * _round_up(KC, 128) * 2 +
                             2 * _round_up(NO, 128) * 4)
    est = 2 * (in_blk + out_blk + w_blk) + tmp
    vmem_limit = int(min(_vmem_capacity_bytes() * 3 // 4,
                         max(32 * 1024 * 1024, 2 * est)))

    return pl.pallas_call(
        _make_kernel(Ho, Wo, KC, NO),
        out_shape=jax.ShapeDtypeStruct((B, NO, M), jnp.float32),
        grid=(B,),
        in_specs=[
            pl.BlockSpec((1, Hp, Wp, KC), lambda b: (b, 0, 0, 0)),
            pl.BlockSpec((9, KC, NO), lambda b: (0, 0, 0)),
            pl.BlockSpec((1, NO), lambda b: (0, 0)),
        ],
        out_specs=pl.BlockSpec((1, NO, M), lambda b: (b, 0, 0)),
        compiler_params=pltpu.CompilerParams(
            dimension_semantics=("parallel",),   # batch across v7x's 2 TCs
            vmem_limit_bytes=vmem_limit,
        ),
    )(planes, w_taps, bias)


# -----------------------------------------------------------------------------
# Plain-JAX prep: crops, downsample, zero-insertion, weight/bias reshaping
# -----------------------------------------------------------------------------
def _crop(x, border):
    if border == 0:
        return x
    return x[:, :, border:x.shape[2] - border, border:x.shape[3] - border]


def _zero_insert(x, s):
    B, C, H, W = x.shape
    out = jnp.zeros((B, C, (H - 1) * s + 1, (W - 1) * s + 1), x.dtype)
    return out.at[:, :, ::s, ::s].set(x)


def _nhwc(x):
    return x.transpose(0, 2, 3, 1)


def _conv_tap_weights(w):      # Conv2d weight (oc, C, 3, 3) -> (9, C, oc)
    return w.transpose(2, 3, 1, 0).reshape(9, w.shape[1], w.shape[0])


def _convT_tap_weights(w):     # ConvTranspose2d weight (C, oc, 3, 3) -> (9, C, oc)
    wf = jnp.flip(w, axis=(2, 3))
    return wf.transpose(2, 3, 0, 1).reshape(9, w.shape[0], w.shape[1])


def init_params(key, in_channels, out_channels):
    oc = out_channels // 4
    ks = jax.random.split(key, 8)

    def u(k, shape, fan_in):
        bound = 1.0 / float(np.sqrt(fan_in))
        return jax.random.uniform(k, shape, jnp.float32, -bound, bound)

    fan_c = in_channels * 9   # Conv2d fan-in
    fan_t = oc * 9            # ConvTranspose2d fan-in (weight dim 1 * k*k)
    return {
        "w1": u(ks[0], (oc, in_channels, 3, 3), fan_c),
        "b1": u(ks[1], (oc,), fan_c),
        "w2": u(ks[2], (oc, in_channels, 3, 3), fan_c),
        "b2": u(ks[3], (oc,), fan_c),
        "w3": u(ks[4], (in_channels, oc, 3, 3), fan_t),
        "b3": u(ks[5], (oc,), fan_t),
        "w4": u(ks[6], (in_channels, oc, 3, 3), fan_t),
        "b4": u(ks[7], (oc,), fan_t),
    }


def foveated_conv2d_forward(x, params, *, input_size, compute_dtype=jnp.bfloat16):
    B, C, H, W = x.shape
    assert H == input_size and W == input_size
    assert input_size % 16 == 0, "input_size must be divisible by 16"
    S = input_size
    oc = params["w1"].shape[0]
    Ho = Wo = S // 2

    border2 = (S - S // 2) // 2
    border3 = (S - S // 4) // 2
    border4 = (S - S // 8) // 2

    xc = x.astype(compute_dtype)     # bf16 inputs halve HBM reads, MXU-native

    # --- per-branch input planes, all (B, Ho+2, Wo+2, C), channels-last -------
    p1 = jnp.pad(_nhwc(xc[:, :, ::2, ::2]), ((0, 0), (1, 1), (1, 1), (0, 0)))
    p2 = jnp.pad(_nhwc(_crop(xc, border2)), ((0, 0), (1, 1), (1, 1), (0, 0)))
    p3 = jnp.pad(_nhwc(_zero_insert(_crop(xc, border3), 2)),
                 ((0, 0), (1, 2), (1, 2), (0, 0)))
    p4 = jnp.pad(_nhwc(_zero_insert(_crop(xc, border4), 4)),
                 ((0, 0), (2, 3), (2, 3), (0, 0)))
    planes = jnp.concatenate([p1, p2, p3, p4], axis=-1)   # (B, Ho+2, Wo+2, 4C)

    # --- block-diagonal per-tap weights (9, 4C, 4oc) and fused bias -----------
    wt = [_conv_tap_weights(params["w1"]), _conv_tap_weights(params["w2"]),
          _convT_tap_weights(params["w3"]), _convT_tap_weights(params["w4"])]
    w_taps = jnp.zeros((9, 4 * C, 4 * oc), jnp.float32)
    for i, wi in enumerate(wt):
        w_taps = w_taps.at[:, i * C:(i + 1) * C, i * oc:(i + 1) * oc].set(wi)
    w_taps = w_taps.astype(compute_dtype)
    bias = jnp.concatenate([params["b1"], params["b2"],
                            params["b3"], params["b4"]]
                           ).reshape(1, 4 * oc).astype(jnp.float32)

    out = _fused_conv(planes, w_taps, bias, Ho, Wo)        # (B, 4oc, Ho*Wo) f32
    # trailing-dim split == layout-preserving (free) reshape; channel order is
    # branch-major, identical to torch.cat((x1, x2, x3, x4), dim=1)
    out = out.reshape(B, 4 * oc, Ho, Wo)
    return out.astype(x.dtype)


# -----------------------------------------------------------------------------
# Pure-JAX reference (lax convs, f32 HIGHEST) for correctness check
# -----------------------------------------------------------------------------
def reference_forward(x, params, input_size):
    S = input_size
    dn = ('NCHW', 'OIHW', 'NCHW')
    border2 = (S - S // 2) // 2
    border3 = (S - S // 4) // 2
    border4 = (S - S // 8) // 2
    hp = jax.lax.Precision.HIGHEST

    x1 = lax.conv_general_dilated(x, params["w1"], (2, 2), [(2, 2), (2, 2)],
                                  rhs_dilation=(2, 2), dimension_numbers=dn,
                                  precision=hp) + params["b1"][None, :, None, None]
    x2 = lax.conv_general_dilated(_crop(x, border2), params["w2"], (1, 1),
                                  [(1, 1), (1, 1)], dimension_numbers=dn,
                                  precision=hp) + params["b2"][None, :, None, None]
    w3c = jnp.flip(params["w3"], axis=(2, 3)).transpose(1, 0, 2, 3)
    x3 = lax.conv_general_dilated(_crop(x, border3), w3c, (1, 1),
                                  [(1, 2), (1, 2)], lhs_dilation=(2, 2),
                                  dimension_numbers=dn,
                                  precision=hp) + params["b3"][None, :, None, None]
    w4c = jnp.flip(params["w4"], axis=(2, 3)).transpose(1, 0, 2, 3)
    x4 = lax.conv_general_dilated(_crop(x, border4), w4c, (1, 1),
                                  [(2, 3), (2, 3)], lhs_dilation=(4, 4),
                                  dimension_numbers=dn,
                                  precision=hp) + params["b4"][None, :, None, None]
    return jnp.concatenate([x1, x2, x3, x4], axis=1)


if __name__ == "__main__":
    key = jax.random.PRNGKey(0)
    kx, kp = jax.random.split(key)

    B, Cin, S = 2, 4, 16        # input_size must be divisible by 16
    Cout = 8                    # 4 branches * 2 channels each

    x = jax.random.normal(kx, (B, Cin, S, S), jnp.float32)
    params = init_params(kp, Cin, Cout)

    fwd = jax.jit(functools.partial(foveated_conv2d_forward, input_size=S))
    out = jax.block_until_ready(fwd(x, params))
    assert out.shape == (B, Cout, S // 2, S // 2), out.shape

    ref = jax.block_until_ready(reference_forward(x, params, S))
    # bf16 MXU inputs (f32 accumulation) vs f32 reference -> bf16-level tolerance
    np.testing.assert_allclose(np.asarray(out), np.asarray(ref),
                               rtol=2e-2, atol=2e-2)
    print("KERNEL_OK")
</pallas_src>

<mosaic_0001>
module attributes {stable_mosaic.version = 11 : i64} {
  func.func @kernel(%arg0: i32, %arg1: memref<1x10x10x16xbf16, #tpu.memory_space<vmem>>, %arg2: memref<9x16x8xbf16, #tpu.memory_space<vmem>>, %arg3: memref<1x8xf32, #tpu.memory_space<vmem>>, %arg4: memref<1x8x64xf32, #tpu.memory_space<vmem>>) attributes {dimension_semantics = [#tpu.dimension_semantics<parallel>], iteration_bounds = array<i64: 2>, scalar_prefetch = 0 : i64, scratch_operands = 0 : i64, tpu.core_type = #tpu.core_type<tc>, window_params = [{transform_indices = @transform_0, window_bounds = array<i64: 1, 10, 10, 16>}, {pipeline_mode = #tpu.pipeline_mode<synchronous>, transform_indices = @transform_1, window_bounds = array<i64: 9, 16, 8>}, {pipeline_mode = #tpu.pipeline_mode<synchronous>, transform_indices = @transform_2, window_bounds = array<i64: 1, 8>}, {transform_indices = @transform_3, window_bounds = array<i64: 1, 8, 64>}]} {
    %c0 = arith.constant 0 : index
    %c0_0 = arith.constant 0 : index
    %c0_1 = arith.constant 0 : index
    %c0_2 = arith.constant 0 : index
    %0 = vector.load %arg1[%c0, %c0_0, %c0_1, %c0_2] : memref<1x10x10x16xbf16, #tpu.memory_space<vmem>>, vector<1x10x10x16xbf16>
    %1 = vector.shape_cast %0 : vector<1x10x10x16xbf16> to vector<10x10x16xbf16>
    %cst = arith.constant 0.000000e+00 : f32
    %2 = vector.broadcast %cst : f32 to vector<64x8xf32>
    %3 = vector.extract_strided_slice %1 {offsets = [0, 0, 0], sizes = [8, 8, 16], strides = [1, 1, 1]} : vector<10x10x16xbf16> to vector<8x8x16xbf16>
    %4 = vector.shape_cast %3 : vector<8x8x16xbf16> to vector<64x16xbf16>
    %c0_3 = arith.constant 0 : index
    %c0_4 = arith.constant 0 : index
    %c0_5 = arith.constant 0 : index
    %5 = vector.load %arg2[%c0_3, %c0_4, %c0_5] : memref<9x16x8xbf16, #tpu.memory_space<vmem>>, vector<1x16x8xbf16>
    %6 = vector.shape_cast %5 : vector<1x16x8xbf16> to vector<16x8xbf16>
    %cst_6 = arith.constant dense<0.000000e+00> : vector<64x8xf32>
    %7 = tpu.matmul %4, %6, %cst_6 {dimension_numbers = #tpu.dot_dimension_numbers<[1], [0], [0], [1], [0, 0, 1, 1], [], []>} : vector<64x16xbf16>, vector<16x8xbf16>, vector<64x8xf32> -> vector<64x8xf32>
    %8 = arith.addf %2, %7 : vector<64x8xf32>
    %9 = vector.extract_strided_slice %1 {offsets = [0, 1, 0], sizes = [8, 8, 16], strides = [1, 1, 1]} : vector<10x10x16xbf16> to vector<8x8x16xbf16>
    %10 = vector.shape_cast %9 : vector<8x8x16xbf16> to vector<64x16xbf16>
    %c1 = arith.constant 1 : index
    %c0_7 = arith.constant 0 : index
    %c0_8 = arith.constant 0 : index
    %11 = vector.load %arg2[%c1, %c0_7, %c0_8] : memref<9x16x8xbf16, #tpu.memory_space<vmem>>, vector<1x16x8xbf16>
    %12 = vector.shape_cast %11 : vector<1x16x8xbf16> to vector<16x8xbf16>
    %cst_9 = arith.constant dense<0.000000e+00> : vector<64x8xf32>
    %13 = tpu.matmul %10, %12, %cst_9 {dimension_numbers = #tpu.dot_dimension_numbers<[1], [0], [0], [1], [0, 0, 1, 1], [], []>} : vector<64x16xbf16>, vector<16x8xbf16>, vector<64x8xf32> -> vector<64x8xf32>
    %14 = arith.addf %8, %13 : vector<64x8xf32>
    %15 = vector.extract_strided_slice %1 {offsets = [0, 2, 0], sizes = [8, 8, 16], strides = [1, 1, 1]} : vector<10x10x16xbf16> to vector<8x8x16xbf16>
    %16 = vector.shape_cast %15 : vector<8x8x16xbf16> to vector<64x16xbf16>
    %c2 = arith.constant 2 : index
    %c0_10 = arith.constant 0 : index
    %c0_11 = arith.constant 0 : index
    %17 = vector.load %arg2[%c2, %c0_10, %c0_11] : memref<9x16x8xbf16, #tpu.memory_space<vmem>>, vector<1x16x8xbf16>
    %18 = vector.shape_cast %17 : vector<1x16x8xbf16> to vector<16x8xbf16>
    %cst_12 = arith.constant dense<0.000000e+00> : vector<64x8xf32>
    %19 = tpu.matmul %16, %18, %cst_12 {dimension_numbers = #tpu.dot_dimension_numbers<[1], [0], [0], [1], [0, 0, 1, 1], [], []>} : vector<64x16xbf16>, vector<16x8xbf16>, vector<64x8xf32> -> vector<64x8xf32>
    %20 = arith.addf %14, %19 : vector<64x8xf32>
    %21 = vector.extract_strided_slice %1 {offsets = [1, 0, 0], sizes = [8, 8, 16], strides = [1, 1, 1]} : vector<10x10x16xbf16> to vector<8x8x16xbf16>
    %22 = vector.shape_cast %21 : vector<8x8x16xbf16> to vector<64x16xbf16>
    %c3 = arith.constant 3 : index
    %c0_13 = arith.constant 0 : index
    %c0_14 = arith.constant 0 : index
    %23 = vector.load %arg2[%c3, %c0_13, %c0_14] : memref<9x16x8xbf16, #tpu.memory_space<vmem>>, vector<1x16x8xbf16>
    %24 = vector.shape_cast %23 : vector<1x16x8xbf16> to vector<16x8xbf16>
    %cst_15 = arith.constant dense<0.000000e+00> : vector<64x8xf32>
    %25 = tpu.matmul %22, %24, %cst_15 {dimension_numbers = #tpu.dot_dimension_numbers<[1], [0], [0], [1], [0, 0, 1, 1], [], []>} : vector<64x16xbf16>, vector<16x8xbf16>, vector<64x8xf32> -> vector<64x8xf32>
    %26 = arith.addf %20, %25 : vector<64x8xf32>
    %27 = vector.extract_strided_slice %1 {offsets = [1, 1, 0], sizes = [8, 8, 16], strides = [1, 1, 1]} : vector<10x10x16xbf16> to vector<8x8x16xbf16>
    %28 = vector.shape_cast %27 : vector<8x8x16xbf16> to vector<64x16xbf16>
    %c4 = arith.constant 4 : index
    %c0_16 = arith.constant 0 : index
    %c0_17 = arith.constant 0 : index
    %29 = vector.load %arg2[%c4, %c0_16, %c0_17] : memref<9x16x8xbf16, #tpu.memory_space<vmem>>, vector<1x16x8xbf16>
    %30 = vector.shape_cast %29 : vector<1x16x8xbf16> to vector<16x8xbf16>
    %cst_18 = arith.constant dense<0.000000e+00> : vector<64x8xf32>
    %31 = tpu.matmul %28, %30, %cst_18 {dimension_numbers = #tpu.dot_dimension_numbers<[1], [0], [0], [1], [0, 0, 1, 1], [], []>} : vector<64x16xbf16>, vector<16x8xbf16>, vector<64x8xf32> -> vector<64x8xf32>
    %32 = arith.addf %26, %31 : vector<64x8xf32>
    %33 = vector.extract_strided_slice %1 {offsets = [1, 2, 0], sizes = [8, 8, 16], strides = [1, 1, 1]} : vector<10x10x16xbf16> to vector<8x8x16xbf16>
    %34 = vector.shape_cast %33 : vector<8x8x16xbf16> to vector<64x16xbf16>
    %c5 = arith.constant 5 : index
    %c0_19 = arith.constant 0 : index
    %c0_20 = arith.constant 0 : index
    %35 = vector.load %arg2[%c5, %c0_19, %c0_20] : memref<9x16x8xbf16, #tpu.memory_space<vmem>>, vector<1x16x8xbf16>
    %36 = vector.shape_cast %35 : vector<1x16x8xbf16> to vector<16x8xbf16>
    %cst_21 = arith.constant dense<0.000000e+00> : vector<64x8xf32>
    %37 = tpu.matmul %34, %36, %cst_21 {dimension_numbers = #tpu.dot_dimension_numbers<[1], [0], [0], [1], [0, 0, 1, 1], [], []>} : vector<64x16xbf16>, vector<16x8xbf16>, vector<64x8xf32> -> vector<64x8xf32>
    %38 = arith.addf %32, %37 : vector<64x8xf32>
    %39 = vector.extract_strided_slice %1 {offsets = [2, 0, 0], sizes = [8, 8, 16], strides = [1, 1, 1]} : vector<10x10x16xbf16> to vector<8x8x16xbf16>
    %40 = vector.shape_cast %39 : vector<8x8x16xbf16> to vector<64x16xbf16>
    %c6 = arith.constant 6 : index
    %c0_22 = arith.constant 0 : index
    %c0_23 = arith.constant 0 : index
    %41 = vector.load %arg2[%c6, %c0_22, %c0_23] : memref<9x16x8xbf16, #tpu.memory_space<vmem>>, vector<1x16x8xbf16>
    %42 = vector.shape_cast %41 : vector<1x16x8xbf16> to vector<16x8xbf16>
    %cst_24 = arith.constant dense<0.000000e+00> : vector<64x8xf32>
    %43 = tpu.matmul %40, %42, %cst_24 {dimension_numbers = #tpu.dot_dimension_numbers<[1], [0], [0], [1], [0, 0, 1, 1], [], []>} : vector<64x16xbf16>, vector<16x8xbf16>, vector<64x8xf32> -> vector<64x8xf32>
    %44 = arith.addf %38, %43 : vector<64x8xf32>
    %45 = vector.extract_strided_slice %1 {offsets = [2, 1, 0], sizes = [8, 8, 16], strides = [1, 1, 1]} : vector<10x10x16xbf16> to vector<8x8x16xbf16>
    %46 = vector.shape_cast %45 : vector<8x8x16xbf16> to vector<64x16xbf16>
    %c7 = arith.constant 7 : index
    %c0_25 = arith.constant 0 : index
    %c0_26 = arith.constant 0 : index
    %47 = vector.load %arg2[%c7, %c0_25, %c0_26] : memref<9x16x8xbf16, #tpu.memory_space<vmem>>, vector<1x16x8xbf16>
    %48 = vector.shape_cast %47 : vector<1x16x8xbf16> to vector<16x8xbf16>
    %cst_27 = arith.constant dense<0.000000e+00> : vector<64x8xf32>
    %49 = tpu.matmul %46, %48, %cst_27 {dimension_numbers = #tpu.dot_dimension_numbers<[1], [0], [0], [1], [0, 0, 1, 1], [], []>} : vector<64x16xbf16>, vector<16x8xbf16>, vector<64x8xf32> -> vector<64x8xf32>
    %50 = arith.addf %44, %49 : vector<64x8xf32>
    %51 = vector.extract_strided_slice %1 {offsets = [2, 2, 0], sizes = [8, 8, 16], strides = [1, 1, 1]} : vector<10x10x16xbf16> to vector<8x8x16xbf16>
    %52 = vector.shape_cast %51 : vector<8x8x16xbf16> to vector<64x16xbf16>
    %c8 = arith.constant 8 : index
    %c0_28 = arith.constant 0 : index
    %c0_29 = arith.constant 0 : index
    %53 = vector.load %arg2[%c8, %c0_28, %c0_29] : memref<9x16x8xbf16, #tpu.memory_space<vmem>>, vector<1x16x8xbf16>
    %54 = vector.shape_cast %53 : vector<1x16x8xbf16> to vector<16x8xbf16>
    %cst_30 = arith.constant dense<0.000000e+00> : vector<64x8xf32>
    %55 = tpu.matmul %52, %54, %cst_30 {dimension_numbers = #tpu.dot_dimension_numbers<[1], [0], [0], [1], [0, 0, 1, 1], [], []>} : vector<64x16xbf16>, vector<16x8xbf16>, vector<64x8xf32> -> vector<64x8xf32>
    %56 = arith.addf %50, %55 : vector<64x8xf32>
    %c0_31 = arith.constant 0 : index
    %c0_32 = arith.constant 0 : index
    %57 = vector.load %arg3[%c0_31, %c0_32] : memref<1x8xf32, #tpu.memory_space<vmem>>, vector<1x8xf32>
    %58 = vector.broadcast %57 : vector<1x8xf32> to vector<64x8xf32>
    %59 = arith.addf %56, %58 : vector<64x8xf32>
    %60 = tpu.transpose %59, [1, 0] : vector<64x8xf32> -> vector<8x64xf32>
    %c0_33 = arith.constant 0 : index
    %c0_34 = arith.constant 0 : index
    %c0_35 = arith.constant 0 : index
    %61 = vector.load %arg4[%c0_33, %c0_34, %c0_35] : memref<1x8x64xf32, #tpu.memory_space<vmem>>, vector<1x8x64xf32>
    %62 = vector.shape_cast %61 : vector<1x8x64xf32> to vector<8x64xf32>
    %63 = vector.shape_cast %60 : vector<8x64xf32> to vector<1x8x64xf32>
    tpu.vector_store %arg4[%c0_33, %c0_34, %c0_35], %63 {strides = array<i32>} : memref<1x8x64xf32, #tpu.memory_space<vmem>>, vector<1x8x64xf32>,
    return
  }
  func.func @transform_0(%arg0: i32) -> (i32, i32, i32, i32) {
    %c0_i32 = arith.constant 0 : i32
    %c0_i32_0 = arith.constant 0 : i32
    %c0_i32_1 = arith.constant 0 : i32
    %c0_i32_2 = arith.constant 0 : i32
    return %arg0, %c0_i32, %c0_i32_0, %c0_i32_1 : i32, i32, i32, i32
  }
  func.func @transform_1(%arg0: i32) -> (i32, i32, i32) {
    %c0_i32 = arith.constant 0 : i32
    %c0_i32_0 = arith.constant 0 : i32
    %c0_i32_1 = arith.constant 0 : i32
    %c0_i32_2 = arith.constant 0 : i32
    return %c0_i32, %c0_i32_0, %c0_i32_1 : i32, i32, i32
  }
  func.func @transform_2(%arg0: i32) -> (i32, i32) {
    %c0_i32 = arith.constant 0 : i32
    %c0_i32_0 = arith.constant 0 : i32
    %c0_i32_1 = arith.constant 0 : i32
    return %c0_i32, %c0_i32_0 : i32, i32
  }
  func.func @transform_3(%arg0: i32) -> (i32, i32, i32) {
    %c0_i32 = arith.constant 0 : i32
    %c0_i32_0 = arith.constant 0 : i32
    %c0_i32_1 = arith.constant 0 : i32
    return %arg0, %c0_i32, %c0_i32_0 : i32, i32, i32
  }
}

</mosaic_0001>

<bundles_post_ra>
// kernel: foveated_conv2d_forward.1
= control target key start
LH: loop header
LB: loop body
LE: loop exit
PB: predicated region body
PF: predicated region fallthrough
CT: control target
= control target key end

     0   :  { %s1723_s12 = smov 0   ;;  %s2037_s0 = inlined_call_operand.vmem [shape: bf16[2,10,10,16], index: 0, kind: input, shape index: {}]   ;;  %s2038_s1 = inlined_call_operand.vmem [shape: bf16[9,16,8], index: 1, kind: input, shape index: {}]   ;;  %s2039_s2 = inlined_call_operand.vmem [shape: f32[1,8], index: 2, kind: input, shape index: {}]   ;;  %s2040_s3 = inlined_call_operand.vmem [shape: f32[2,8,64], index: 3, kind: output, shape index: {}]  }
   0x1 LB: > { %s1358_s13 = sadd.s32 4294967295, %s1701_s12   ;;  %p1362_p0 = scmp.ge.s32.totalorder %s1701_s12, 1  ;;  %s1701_s12 = sphi %s1723_s12, %s13_s12  }
   0x2   : > { %p137_p1 = scmp.lt.s32.totalorder %s1701_s12, 3 }
   0x4   : > { %p138_p2 = pnand %p1362_p0, %p137_p1 }
   0x5   : > { %v1734_v0 = vld [vmem:[%s2038_s1 + $0x20] sm:$0xff] (!%p138_p2)   ;;  %p160_p3 = scmp.lt.s32.totalorder (!%p138_p2), %s1358_s13, 1  ;;  %v1678_v1 = vld [vmem:[%s2038_s1 + $0x8] sm:$0xff] (!%p138_p2)   ;;  %vm192_vm0 = vsmask.f32 (!%p138_p2), 3328  ;;  %vm328_vm2 = vcmask (!%p138_p2), 130048  }
   0x6   : > { %141 = sbr.rel (%p138_p2) target bundleno = 444 (0x1bc), region = 32  ;;  %1551 = vmatprep.subr.bf16.mxu0 (!%p138_p2), %v1734_v0  ;;  %v1745_v2 = vld [vmem:[%s2038_s1 + $0x28] sm:$0xff] (!%p138_p2)   ;;  %1511 = vmatprep.subr.bf16.mxu1 (!%p138_p2), %v1678_v1  ;;  %v1753_v3 = vld [vmem:[%s2038_s1] sm:$0xff] (!%p138_p2)   ;;  %vm193_vm1 = vsmask.f32 (!%p138_p2), 7440  ;;  %vm517_vm4 = vcmask (!%p138_p2), 1042432  }
   0x7   : > { %1552 = vmatpush3.bf16.msra.mxu0 (!%p138_p2), %v1734_v0  ;;  %1512 = vmatpush3.bf16.msra.mxu1 (!%p138_p2), %v1678_v1  ;;  %vm1796_vm3 = vmor (!%p138_p2), %vm192_vm0, %vm193_vm1  ;;  %vm518_vm5 = vcmask (!%p138_p2), 1046532   ;;  %vm1303_vm7 = vcmask (!%p138_p2), 523264  }
   0x8   : > { %1561 = vmatprep.subr.bf16.mxu0 (!%p138_p2), %v1745_v2  ;;  %1521 = vmatprep.subr.bf16.mxu1 (!%p138_p2), %v1753_v3  ;;  %vm1867_vm6 = vmor (!%p138_p2), %vm517_vm4, %vm518_vm5 }
   0xd   : > { %s2046_s13 = smov (!%p160_p3, %s1358_s13), 1 }
   0xe   : > { %s1667_s20 = smul.u32 80, %s2046_s13  ;;  %s1364_s11 = sshll.u32 %s2046_s13, 3 }
   0xf   : > { %s168_s16 = scalar_lea.vmem %s2040_s3, %s1364_s11 }
  0x10   : > { %s1758_s25 = scalar_lea.vmem %s2037_s0, %s1667_s20 }
  0x11   : > { %v1762_v4 = vld [vmem:[%s1758_s25] sm:$0xf]  ;;  %v1765_v5 = vld [vmem:[%s1758_s25 + $0x4] sm:$0x1]  ;;  %v1768_v6 = vld [vmem:[%s1758_s25 + $0x8] sm:$0xf] }
  0x12   : > { %v1771_v7 = vld [vmem:[%s1758_s25 + $0xc] sm:$0x1]  ;;  %v196_v8 = vshrl.u32 %v1762_v4, 16  ;;  %v199_v9 = vshll.u32 %v1762_v4, 16  ;;  %v205_v10 = vshll.u32 %v1765_v5, 16  ;;  %v210_v11 = vshrl.u32 %v1768_v6, 16 }
  0x13   : > { %v213_v12 = vshll.u32 %v1768_v6, 16  ;;  %v219_v13 = vshll.u32 %v1771_v7, 16  ;;  %v1780_v14 = vld [vmem:[%s1758_s25 + $0x10] sm:$0xf]  ;;  %v526_v18 = vrot.slane %v1771_v7, 5  ;;  %v1376_v7 = vcombine.low %v1762_v4, %v1768_v6 }
  0x14   : > { %v198_v15 = vrot.slane %v196_v8, 4  ;;  %v201_v16 = vrot.slane %v199_v9, 5  ;;  %v212_v17 = vrot.slane %v210_v11, 4  ;;  %v1784_v19 = vld [vmem:[%s1758_s25 + $0x14] sm:$0x1]  ;;  %v207_v20 = vrot.slane %v205_v10, 5 }
  0x15   : > { %v215_v21 = vrot.slane %v213_v12, 5  ;;  %v1787_v22 = vld [vmem:[%s1758_s25 + $0x18] sm:$0xf]  ;;  %v1790_v23 = vld [vmem:[%s1758_s25 + $0x1c] sm:$0x1]  ;;  %v221_v25 = vrot.slane %v219_v13, 5 }
  0x16   : > { %v202_v24 = vor.u32 %v201_v16, %v198_v15  ;;  %v224_v26 = vshrl.u32 %v1780_v14, 16  ;;  %v227_v27 = vshll.u32 %v1780_v14, 16  ;;  %v1801_v30 = vld [vmem:[%s1758_s25 + $0x20] sm:$0xf]  ;;  %v233_v31 = vshll.u32 %v1784_v19, 16 }
  0x17   : > { %v216_v29 = vor.u32 %v215_v21, %v212_v17  ;;  %v238_v32 = vshrl.u32 %v1787_v22, 16  ;;  %v241_v33 = vshll.u32 %v1787_v22, 16  ;;  %v1807_v35 = vld [vmem:[%s1758_s25 + $0x24] sm:$0x1]  ;;  %v247_v38 = vshll.u32 %v1790_v23, 16 }
  0x18   : > { %v203_v34 = vrot.slane %v202_v24, 4  ;;  %v226_v36 = vrot.slane %v224_v26, 4  ;;  %v229_v37 = vrot.slane %v227_v27, 5  ;;  %v235_v40 = vrot.slane %v233_v31, 5  ;;  %v1814_v47 = vld [vmem:[%s1758_s25 + $0x28] sm:$0xf] }
  0x19   : > { %v217_v39 = vrot.slane %v216_v29, 4  ;;  %v240_v41 = vrot.slane %v238_v32, 4  ;;  %v243_v42 = vrot.slane %v241_v33, 5  ;;  %v249_v45 = vrot.slane %v247_v38, 5  ;;  %v1821_v52 = vld [vmem:[%s1758_s25 + $0x2c] sm:$0x1] }
  0x1a   : > { %v208_v43 = vsel %vm1796_vm3, %v203_v34, %v207_v20  ;;  %v230_v44 = vor.u32 %v229_v37, %v226_v36  ;;  %v252_v46 = vshrl.u32 %v1801_v30, 16  ;;  %v255_v50 = vshll.u32 %v1801_v30, 16  ;;  %v1824_v53 = vld [vmem:[%s1758_s25 + $0x30] sm:$0xf]  ;;  %v1828_v58 = vld [vmem:[%s1758_s25 + $0x34] sm:$0x1] }
  0x1b   : > { %v222_v48 = vsel %vm1796_vm3, %v217_v39, %v221_v25  ;;  %v244_v49 = vor.u32 %v243_v42, %v240_v41  ;;  %v261_v51 = vshll.u32 %v1807_v35, 16  ;;  %v530_v57 = vrot.slane %v1784_v19, 5  ;;  %v1832_v63 = vld [vmem:[%s1758_s25 + $0x38] sm:$0xf]  ;;  %v1844_v16 = vld [vmem:[%s1758_s25 + $0x3c] sm:$0x1] }
  0x1c   : > { %v1367_v54 = vcombine.low %v208_v43, %v222_v48  ;;  %v231_v55 = vrot.slane %v230_v44, 4  ;;  %v254_v56 = vrot.slane %v252_v46, 4  ;;  %v257_v60 = vrot.slane %v255_v50, 5  ;;  %v1852_v24 = vld [vmem:[%s2038_s1 + $0x10] sm:$0xff]  }
  0x1d   : > { %v245_v59 = vrot.slane %v244_v49, 4  ;;  %v263_v61 = vrot.slane %v261_v51, 5  ;;  %v534_v62 = vrot.slane %v1790_v23, 5  ;;  %v538_v8 = vrot.slane %v1807_v35, 5 }
  0x1e   : > { %1513 = vmatprep.mubr.msk.bf16.mxu1 %vm328_vm2, %v1367_v54  ;;  %v236_v1 = vsel %vm1796_vm3, %v231_v55, %v235_v40  ;;  %v266_v9 = vshrl.u32 %v1814_v47, 16  ;;  %v269_v10 = vshll.u32 %v1814_v47, 16  ;;  %v258_v12 = vor.u32 %v257_v60, %v254_v56 }
  0x1f   : > { %v250_v11 = vsel %vm1796_vm3, %v245_v59, %v249_v45  ;;  %v1417_v13 = vcombine.low %v222_v48, %v236_v1  ;;  %v275_v15 = vshll.u32 %v1821_v52, 16  ;;  %v280_v21 = vshrl.u32 %v1824_v53, 16  ;;  %v1681_v45 = vld [vmem:[%s2038_s1 + $0x30] sm:$0xff]  }
  0x20   : > { %v1846_v17 = vcombine.low %v236_v1, %v250_v11  ;;  %v268_v19 = vrot.slane %v266_v9, 4  ;;  %v271_v20 = vrot.slane %v269_v10, 5  ;;  %v259_v25 = vrot.slane %v258_v12, 4 }
  0x21   : > { %1553 = vmatprep.mubr.msk.bf16.mxu0 %vm328_vm2, %v1417_v13  ;;  %v277_v26 = vrot.slane %v275_v15, 5  ;;  %v283_v27 = vshll.u32 %v1824_v53, 16  ;;  %v289_v29 = vshll.u32 %v1828_v58, 16  ;;  %v282_v32 = vrot.slane %v280_v21, 4  ;;  %v1931_v21 = vld [vmem:[%s1758_s25 + $0x44] sm:$0x1] }
  0x22   : > { %1514 = vmatmul.mubr.msk.bf16.vlgmr.msra.gmra.mrb[0].mxu1 %vm328_vm2, %v1846_v17  ;;  %v272_v31 = vor.u32 %v271_v20, %v268_v19  ;;  %v294_v33 = vshrl.u32 %v1832_v63, 16  ;;  %v297_v34 = vshll.u32 %v1832_v63, 16  ;;  %v264_v36 = vsel %vm1796_vm3, %v259_v25, %v263_v61  ;;  %v1928_v20 = vld [vmem:[%s1758_s25 + $0x40] sm:$0xf] }
  0x23   : > { %v285_v37 = vrot.slane %v283_v27, 5  ;;  %v291_v38 = vrot.slane %v289_v29, 5  ;;  %v303_v39 = vshll.u32 %v1844_v16, 16  ;;  %1522 = vmatpush3.bf16.msra.mxu1 %v1753_v3  ;;  %v1418_v40 = vcombine.low %v250_v11, %v264_v36  ;;  %v1687_v27 = vld [vmem:[%s2038_s1 + $0x38] sm:$0xff]  }
  0x24   : > { %v273_v41 = vrot.slane %v272_v31, 4  ;;  %v296_v42 = vrot.slane %v294_v33, 4  ;;  %v299_v43 = vrot.slane %v297_v34, 5  ;;  %1531 = vmatprep.subr.bf16.mxu1 %v1852_v24  ;;  %v1386_v3 = vrot.slane %v1768_v6, 9 }
  0x25   : > { %v286_v46 = vor.u32 %v285_v37, %v282_v32  ;;  %v305_v48 = vrot.slane %v303_v39, 5  ;;  %v1387_v49 = vrot.slane %v1780_v14, 9  ;;  %1554 = vmatmul.mubr.msk.bf16.vlgmr.msra.gmra.mrb[0].mxu0 %vm328_vm2, %v1418_v40  ;;  %v1388_v54 = vrot.slane %v1787_v22, 9  ;;  %v189_v37 = vld [vmem:[%s1758_s25 + $0x4c] sm:$0x1] }
  0x26   : > { %v1880_v50 = vsel %vm1796_vm3, %v273_v41, %v277_v26  ;;  %v300_v51 = vor.u32 %v299_v43, %v296_v42  ;;  %v1389_v55 = vrot.slane %v1801_v30, 9  ;;  %1562 = vmatpush3.bf16.msra.mxu0 %v1745_v2  ;;  %v527_v60 = vsel %vm1867_vm6, %v1386_v3, %v526_v18 }
  0x27   : > { %v1886_v56 = vcombine.low %v264_v36, %v1880_v50  ;;  %v287_v59 = vrot.slane %v286_v46, 4  ;;  %v531_v61 = vsel %vm1867_vm6, %v1387_v49, %v530_v57  ;;  %1571 = vmatprep.subr.bf16.mxu0 %v1681_v45  ;;  %v1390_v18 = vrot.slane %v1814_v47, 9  ;;  %v188_v36 = vld [vmem:[%s1758_s25 + $0x48] sm:$0xf] }
  0x28   : > { %v301_v1 = vrot.slane %v300_v51, 4  ;;  %v1429_v9 = vcombine.low %v527_v60, %v531_v61  ;;  %v542_v10 = vrot.slane %v1821_v52, 5  ;;  %v1391_v11 = vrot.slane %v1824_v53, 9 }
  0x29   : > { %1517 = vmatprep.mubr.msk.bf16.mxu1 %vm328_vm2, %v1886_v56  ;;  %v1898_v2 = vsel %vm1796_vm3, %v287_v59, %v291_v38  ;;  %v546_v12 = vrot.slane %v1828_v58, 5  ;;  %v535_v15 = vsel %vm1867_vm6, %v1388_v54, %v534_v62  ;;  %v539_v19 = vsel %vm1867_vm6, %v1389_v55, %v538_v8 }
  0x2a   : > { %v1905_v57 = vsel %vm1796_vm3, %v301_v1, %v305_v48  ;;  %1563 = vmatprep.mubr.msk.bf16.mxu0 %vm328_vm2, %v1429_v9  ;;  %v543_v52 = vsel %vm1867_vm6, %v1390_v18, %v542_v10  ;;  %v1430_v23 = vcombine.low %v535_v15, %v539_v19  ;;  %v1392_v35 = vrot.slane %v1832_v63, 9 }
  0x2b   : > { %v1913_v13 = vcombine.low %v1898_v2, %v1905_v57  ;;  %v547_v58 = vsel %vm1867_vm6, %v1391_v11, %v546_v12  ;;  %v550_v8 = vrot.slane %v1844_v16, 5  ;;  %v1426_v25 = vrot.slane %v1928_v20, 9 }
  0x2c   : > { %v1431_v62 = vcombine.low %v543_v52, %v547_v58  ;;  %v874_v26 = vrot.slane %v1931_v21, 5  ;;  %v1377_v29 = vcombine.low %v1780_v14, %v1787_v22  ;;  %v522_v31 = vrot.slane %v1765_v5, 5  ;;  %v1689_v5 = vld [vmem:[%s2038_s1 + $0x18] sm:$0xff]  }
  0x2d   : > { %1518 = vmatmul.mubr.msk.bf16.gmra.mrb[4].mxu1 %vm328_vm2, %v1913_v13  ;;  %v1378_v32 = vcombine.low %v1801_v30, %v1814_v47  ;;  %v551_v16 = vsel %vm1867_vm6, %v1392_v35, %v550_v8  ;;  %v1385_v34 = vrot.slane %v1762_v4, 9  ;;  %v1454_v38 = vrot.slane %v188_v36, 9 }
  0x2e   : > { %1523 = vmatprep.mubr.msk.bf16.mxu1 %vm328_vm2, %v1376_v7  ;;  %v1954_v33 = vsel %vm1867_vm6, %v1426_v25, %v874_v26  ;;  %v1167_v39 = vrot.slane %v189_v37, 5  ;;  %v1379_v42 = vcombine.low %v1824_v53, %v1832_v63  ;;  %v1397_v44 = vcombine.low %v539_v19, %v543_v52 }
  0x2f   : > { %v1432_v40 = vcombine.low %v551_v16, %v1954_v33  ;;  %v523_v41 = vsel %vm1867_vm6, %v1385_v34, %v522_v31  ;;  %v1064_v46 = vshrl.u32 %v188_v36, 16  ;;  %v1067_v48 = vshll.u32 %v188_v36, 16 }
  0x30   : > { %v1968_v4 = vsel %vm1867_vm6, %v1454_v38, %v1167_v39  ;;  %v1395_v43 = vcombine.low %v523_v41, %v527_v60  ;;  %v759_v3 = vshrl.u32 %v1928_v20, 16  ;;  %v762_v49 = vshll.u32 %v1928_v20, 16 }
  0x31   : > { %1564 = vmatmul.mubr.msk.bf16.vlgmr.msra.gmra.mrb[0].mxu0 %vm328_vm2, %v1430_v23  ;;  %v1440_v51 = vcombine.low %v1928_v20, %v188_v36  ;;  %v1066_v59 = vrot.slane %v1064_v46, 4  ;;  %v1069_v60 = vrot.slane %v1067_v48, 5  ;;  %v1406_v1 = vcombine.low %v1768_v6, %v1780_v14 }
  0x32   : > { %1572 = vmatpush3.bf16.msra.mxu0 %v1681_v45  ;;  %1567 = vmatprep.mubr.msk.bf16.mxu0 %vm328_vm2, %v1431_v62  ;;  %v1396_v45 = vcombine.low %v531_v61, %v535_v15  ;;  %v761_v54 = vrot.slane %v759_v3, 4  ;;  %v764_v55 = vrot.slane %v762_v49, 5  ;;  %v1398_v61 = vcombine.low %v547_v58, %v551_v16 }
  0x33   : > { %1581 = vmatprep.subr.bf16.mxu0 %v1687_v27  ;;  %v768_v7 = vshll.u32 %v1931_v21, 16  ;;  %v1070_v18 = vor.u32 %v1069_v60, %v1066_v59  ;;  %v1073_v10 = vshll.u32 %v189_v37, 16  ;;  %v1407_v52 = vcombine.low %v1787_v22, %v1801_v30 }
  0x34   : > { %v765_v9 = vor.u32 %v764_v55, %v761_v54  ;;  %v1408_v6 = vcombine.low %v1814_v47, %v1824_v53  ;;  %v1409_v22 = vcombine.low %v1832_v63, %v1928_v20  ;;  %v1419_v30 = vcombine.low %v1880_v50, %v1898_v2  ;;  %v1463_v20 = vld [vmem:[%s2039_s2] ss:$0 sm:$0xff] }
  0x35   : > { %1524 = vmatmul.mubr.msk.bf16.vlgmr.msra.gmra.mrb[0].mxu1 %vm328_vm2, %v1377_v29  ;;  %v770_v12 = vrot.slane %v768_v7, 5  ;;  %v1071_v15 = vrot.slane %v1070_v18, 4  ;;  %v1075_v19 = vrot.slane %v1073_v10, 5  ;;  %v1457_v28 = vcombine.low %v1954_v33, %v1968_v4 }
  0x36   : > { %1527 = vmatprep.mubr.msk.bf16.mxu1 %vm328_vm2, %v1378_v32  ;;  %1532 = vmatpush3.bf16.msra.mxu1 %v1852_v24  ;;  %v1690_v24 = vld [vmem:[%s2038_s1 + $0x40] sm:$0xff]   ;;  %v766_v11 = vrot.slane %v765_v9, 4 }
  0x37   : > { %1541 = vmatprep.subr.bf16.mxu1 %v1689_v5 }
  0x38   : > { %v771_v14 = vsel %vm1796_vm3, %v766_v11, %v770_v12 }
  0x39   : > { %1568 = vmatmul.mubr.msk.bf16.gmra.mrb[4].mxu0 %vm328_vm2, %v1432_v40 }
  0x3a   : > { %1573 = vmatprep.mubr.msk.bf16.mxu0 %vm328_vm2, %v1377_v29 }
  0x3d   : > { %1528 = vmatmul.mubr.msk.bf16.gmra.mrb[4].mxu1 %vm328_vm2, %v1379_v42 }
  0x3e   : > { %1533 = vmatprep.mubr.msk.bf16.mxu1 %vm328_vm2, %v1395_v43 }
  0x41   : > { %1574 = vmatmul.mubr.msk.bf16.vlgmr.msra.gmra.mrb[0].mxu0 %vm328_vm2, %v1378_v32 }
  0x42   : > { %1582 = vmatpush3.bf16.msra.mxu0 %v1687_v27  ;;  %1577 = vmatprep.mubr.msk.bf16.mxu0 %vm328_vm2, %v1379_v42 }
  0x43   : > { %1591 = vmatprep.subr.bf16.mxu0 %v1690_v24 }
  0x45   : > { %1534 = vmatmul.mubr.msk.bf16.vlgmr.msra.gmra.mrb[0].mxu1 %vm328_vm2, %v1396_v45 }
  0x46   : > { %1537 = vmatprep.mubr.msk.bf16.mxu1 %vm328_vm2, %v1397_v44  ;;  %1542 = vmatpush3.bf16.msra.mxu1 %v1689_v5 }
  0x47   : > { %1601 = vmatprep.subr.bf16.mxu1 %v1734_v0 }
  0x49   : > { %1578 = vmatmul.mubr.msk.bf16.gmra.mrb[4].mxu0 %vm328_vm2, %v1440_v51 }
  0x4a   : > { %1583 = vmatprep.mubr.msk.bf16.mxu0 %vm328_vm2, %v1846_v17  ;;  %v1076_v17 = vsel %vm1796_vm3, %v1071_v15, %v1075_v19 }
  0x4b   : > { %v1448_v58 = vcombine.low %v771_v14, %v1076_v17 }
  0x4d   : > { %1538 = vmatmul.mubr.msk.bf16.gmra.mrb[4].mxu1 %vm328_vm2, %v1398_v61 }
  0x4e   : > { %1543 = vmatprep.mubr.msk.bf16.mxu1 %vm328_vm2, %v1406_v1 }
  0x51   : > { %1584 = vmatmul.mubr.msk.bf16.vlgmr.msra.gmra.mrb[0].mxu0 %vm328_vm2, %v1886_v56 }
  0x52   : > { %1592 = vmatpush3.bf16.msra.mxu0 %v1690_v24  ;;  %1587 = vmatprep.mubr.msk.bf16.mxu0 %vm328_vm2, %v1913_v13 }
  0x55   : > { %1544 = vmatmul.mubr.msk.bf16.vlgmr.msra.gmra.mrb[0].mxu1 %vm328_vm2, %v1407_v52 }
  0x56   : > { %1547 = vmatprep.mubr.msk.bf16.mxu1 %vm328_vm2, %v1408_v6  ;;  %1602 = vmatpush3.bf16.msra.mxu1 %v1734_v0  ;;  %v1420_v0 = vcombine.low %v1905_v57, %v771_v14 }
  0x59   : > { %1588 = vmatmul.mubr.msk.bf16.gmra.mrb[4].mxu0 %vm328_vm2, %v1448_v58 }
  0x5a   : > { %1593 = vmatprep.mubr.msk.bf16.mxu0 %vm328_vm2, %v1396_v45 }
  0x5d   : > { %1548 = vmatmul.mubr.msk.bf16.gmra.mrb[4].mxu1 %vm328_vm2, %v1409_v22 }
  0x5e   : > { %1557 = vmatprep.mubr.msk.bf16.mxu1 %vm328_vm2, %v1419_v30 }
  0x61   : > { %1594 = vmatmul.mubr.msk.bf16.vlgmr.msra.gmra.mrb[0].mxu0 %vm328_vm2, %v1397_v44 }
  0x62   : > { %1597 = vmatprep.mubr.msk.bf16.mxu0 %vm328_vm2, %v1398_v61 }
  0x69   : > { %1558 = vmatmul.mubr.msk.bf16.vlgmr.msra.gmra.mrb[4].mxu1 %vm328_vm2, %v1420_v0  ;;  %1598 = vmatmul.mubr.msk.bf16.gmra.mrb[4].mxu0 %vm328_vm2, %v1457_v28 }
 0x128   : > { %v1545_v47 = vpop.f32.mrb[0].mxu1 }
 0x129   : > { %v719_v53 = vpop.f32.mrb[1].mxu1 }
 0x12a   : > { %v1546_v63 = vpop.f32.mrb[2].mxu1 }
 0x12b   : > { %v722_v50 = vpop.f32.mrb[3].mxu1 }
 0x134   : > { %v1595_v56 = vpop.f32.mrb[0].mxu0 }
 0x135   : > { %v1603_v2 = vadd.f32 %v1595_v56, %v1545_v47  ;;  %v1217_v13 = vpop.f32.mrb[1].mxu0 }
 0x136   : > { %v1604_v21 = vadd.f32 %v1217_v13, %v719_v53  ;;  %v1596_v57 = vpop.f32.mrb[2].mxu0 }
 0x137   : > { %v1605_v23 = vadd.f32 %v1596_v57, %v1546_v63  ;;  %v1220_v35 = vpop.f32.mrb[3].mxu0  ;;  %v1265_v39 = vadd.f32 %v1603_v2, %v1463_v20 }
 0x138   : > { %v1606_v62 = vadd.f32 %v1220_v35, %v722_v50  ;;  %v1263_v8 = vadd.f32 %v1604_v21, %v1463_v20 }
 0x139   : > { %v1266_v40 = vadd.f32 %v1605_v23, %v1463_v20 }
 0x13a   : > { %1271 = vxpose.xlu0.b32.start [1/8] (short) (narrow) %v1263_v8, 8  ;;  %v1264_v29 = vadd.f32 %v1606_v62, %v1463_v20 }
 0x13c   : > { %v1559_v25 = vpop.f32.mrb[4].mxu1  ;;  %v1599_v26 = vpop.f32.mrb[4].mxu0 }
 0x13d   : > { %v848_v27 = vpop.f32.mrb[5].mxu1  ;;  %v1607_v31 = vadd.f32 %v1599_v26, %v1559_v25  ;;  %v1233_v32 = vpop.f32.mrb[5].mxu0 }
 0x13e   : > { %v1560_v16 = vpop.f32.mrb[6].mxu1  ;;  %v1608_v33 = vadd.f32 %v1233_v32, %v848_v27  ;;  %v1600_v34 = vpop.f32.mrb[6].mxu0  ;;  %1272 = vxpose.xlu0.b32.cont [2/8] (short) (narrow) %v1264_v29, 8 }
 0x13f   : > { %v851_v36 = vpop.f32.mrb[7].mxu1  ;;  %v1609_v5 = vadd.f32 %v1600_v34, %v1560_v16  ;;  %v1236_v37 = vpop.f32.mrb[7].mxu0  ;;  %v1269_v42 = vadd.f32 %v1607_v31, %v1463_v20 }
 0x140   : > { %v1610_v38 = vadd.f32 %v1236_v37, %v851_v36  ;;  %v1267_v4 = vadd.f32 %v1608_v33, %v1463_v20 }
 0x141   : > { %v1270_v43 = vadd.f32 %v1609_v5, %v1463_v20 }
 0x142   : > { %1273 = vxpose.xlu0.b32.cont [3/8] (short) (narrow) %v1265_v39, 8  ;;  %v1268_v41 = vadd.f32 %v1610_v38, %v1463_v20 }
 0x146   : > { %1274 = vxpose.xlu0.b32.cont [4/8] (short) (narrow) %v1266_v40, 8 }
 0x14a   : > { %1275 = vxpose.xlu0.b32.cont [5/8] (short) (narrow) %v1267_v4, 8 }
 0x14e   : > { %1276 = vxpose.xlu0.b32.cont [6/8] (short) (narrow) %v1268_v41, 8 }
 0x152   : > { %1277 = vxpose.xlu0.b32.cont [7/8] (short) (narrow) %v1269_v42, 8 }
 0x156   : > { %1278 = vxpose.xlu0.b32.end [8/8] (short) (narrow) %v1270_v43, 8 }
 0x1ba   : > { %v1287_v24 = vpop.trf.xlu0 }
 0x1bb   : > { %1304 = vst.msk [vmem:[%s168_s16] sm:$0xff] %vm1303_vm7, %v1287_v24 }
 0x1bc PF: > { %s13_s12 = sadd.s32 1, %s1701_s12  }
 0x1bd   : > { %p10_p4 = scmp.ge.s32.totalorder %s13_s12, 4  }
 0x1bf   :  { %12 = sbr.rel (!%p10_p4) target bundleno = 1 (0x1), region = 70 }

</bundles_post_ra>
